<compile_context>
chip_gen: v6e
topology: v6e:2x2x1
jax: 0.10.0
libtpu: 0.0.40
codegen_flags: <defaults>
</compile_context>

<pallas_src>
import functools

import jax
import jax.numpy as jnp
from jax import lax
from jax.experimental import pallas as pl
from jax.experimental.pallas import tpu as pltpu


LANE = 128  # TPU lane width; feature dims are zero-padded to a multiple of this.


def _round_up(x, m):
    return (x + m - 1) // m * m


# ----------------------------- Pallas kernel -------------------------------

def _fused_gin_kernel(adj_ref, x_ref, w1_ref, w2_ref, vec_ref, out_ref,
                      *, num_layers, eps_gin, bn_eps):
    """All GIN layers in one invocation: aggregate -> MLP -> BatchNorm -> ReLU per layer.

    adj_ref : [N, N]   bf16 dense adjacency (A[dst, src] = edge multiplicity)
    x_ref   : [N, P]   f32  zero-padded input node features
    w1_ref  : [L, P, P] bf16 stacked first-linear weights (zero-padded)
    w2_ref  : [L, P, P] bf16 stacked second-linear weights (zero-padded)
    vec_ref : [L, 8, P] f32  packed per-layer vectors; rows 0..3 = b1, b2, gamma, beta
    out_ref : [N, P]   f32  lane-dense output (written once)
    """
    adj = adj_ref[...]                                               # bf16 [N, N]

    def layer(l, h):
        # --- GIN message passing: agg[i] = sum over incoming edges of h[src] ----
        agg = jnp.dot(adj, h.astype(jnp.bfloat16),
                      preferred_element_type=jnp.float32)            # f32 [N, P]
        if eps_gin == 0.0:
            h = h + agg                                              # elide (1+0)*h multiply
        else:
            h = (1.0 + eps_gin) * h + agg

        # --- packed per-layer vectors (rows 4..7 are padding) --------------------
        vec = vec_ref[l]                                             # f32 [8, P]
        b1 = vec[0:1, :]
        b2 = vec[1:2, :]
        gamma = vec[2:3, :]
        beta = vec[3:4, :]

        # --- MLP: Linear -> ReLU -> Linear (bf16 MXU inputs, f32 accumulation) ---
        z = jnp.dot(h.astype(jnp.bfloat16), w1_ref[l],
                    preferred_element_type=jnp.float32) + b1
        z = jnp.maximum(z, 0.0)
        z = jnp.dot(z.astype(jnp.bfloat16), w2_ref[l],
                    preferred_element_type=jnp.float32) + b2

        # --- BatchNorm1d, training mode (N > 1): batch stats, biased variance ----
        # Two-pass variance (matches reference; avoids E[h^2]-E[h]^2 cancellation).
        mean = jnp.mean(z, axis=0, keepdims=True)                    # [1, P]
        diff = z - mean
        var = jnp.mean(diff * diff, axis=0, keepdims=True)           # [1, P]
        z = diff * lax.rsqrt(var + bn_eps) * gamma + beta

        # ReLU (also makes the PyTorch trailing torch.abs a no-op).
        return jnp.maximum(z, 0.0)

    h = lax.fori_loop(0, num_layers, layer, x_ref[...], unroll=True)
    out_ref[...] = h


# ------------------------------- glue / model ------------------------------

def build_dense_adjacency(edge_index, num_nodes):
    """A[dst, src] += 1 so that (A @ x)[i] = sum over edges (src -> i) of x[src]."""
    src, dst = edge_index[0], edge_index[1]
    adj = jnp.zeros((num_nodes, num_nodes), dtype=jnp.float32)
    return adj.at[dst, src].add(1.0)


def init_params(key, in_dim, hidden_dim, num_layers):
    """Deterministic synthetic GIN parameters (per layer: MLP Lin-ReLU-Lin + BN)."""
    params = []
    d_in = in_dim
    for _ in range(num_layers):
        key, k1, k2 = jax.random.split(key, 3)
        w1 = jax.random.normal(k1, (d_in, hidden_dim), jnp.float32) * (1.0 / jnp.sqrt(d_in))
        b1 = jnp.zeros((1, hidden_dim), jnp.float32)
        w2 = jax.random.normal(k2, (hidden_dim, hidden_dim), jnp.float32) * (1.0 / jnp.sqrt(hidden_dim))
        b2 = jnp.zeros((1, hidden_dim), jnp.float32)
        gamma = jnp.ones((1, hidden_dim), jnp.float32)
        beta = jnp.zeros((1, hidden_dim), jnp.float32)
        params.append(dict(w1=w1, b1=b1, w2=w2, b2=b2, gamma=gamma, beta=beta))
        d_in = hidden_dim
    return params


def pack_params(params, in_dim, hidden, pad):
    """Zero-pad per-layer weights to [pad, pad] (bf16 for the MXU) and pack the 4
    per-layer vectors into a single f32 (8, pad) tile; stack along a layer axis.

    NOTE: gamma/beta are zero-padded (not one-padded) so padded feature columns stay
    exactly 0 through BatchNorm — do not change this."""
    w1s, w2s, vecs = [], [], []
    d_in = in_dim
    for p in params:
        w1 = jnp.zeros((pad, pad), jnp.float32).at[:d_in, :hidden].set(p["w1"])
        w2 = jnp.zeros((pad, pad), jnp.float32).at[:hidden, :hidden].set(p["w2"])
        vec = jnp.zeros((8, pad), jnp.float32)
        vec = vec.at[0, :hidden].set(p["b1"].reshape(-1))
        vec = vec.at[1, :hidden].set(p["b2"].reshape(-1))
        vec = vec.at[2, :hidden].set(p["gamma"].reshape(-1))
        vec = vec.at[3, :hidden].set(p["beta"].reshape(-1))
        w1s.append(w1.astype(jnp.bfloat16))
        w2s.append(w2.astype(jnp.bfloat16))
        vecs.append(vec)
        d_in = hidden
    return jnp.stack(w1s), jnp.stack(w2s), jnp.stack(vecs)


def atom_feature_extractor(x, edge_index, params, eps_gin=0.0, bn_eps=1e-5):
    """Pallas-backed forward pass of AtomFeatureExtractor (all layers in one kernel)."""
    n, in_dim = x.shape
    hidden = params[0]["w2"].shape[1]
    num_layers = len(params)
    # TODO(synk): N == 1 uses eval-mode BatchNorm (running stats) in the PyTorch module;
    # not implemented here (would need running_mean/var parameters).
    assert n > 1, "training-mode BatchNorm requires more than one node"
    p = _round_up(max(in_dim, hidden), LANE)            # shared padded feature width

    # Adjacency entries are small integer edge counts -> exact in bf16.
    adj = build_dense_adjacency(edge_index, n).astype(jnp.bfloat16)
    x_pad = jnp.zeros((n, p), jnp.float32).at[:, :in_dim].set(x.astype(jnp.float32))
    w1s, w2s, vecs = pack_params(params, in_dim, hidden, p)

    kernel = functools.partial(_fused_gin_kernel, num_layers=num_layers,
                               eps_gin=eps_gin, bn_eps=bn_eps)
    vmem = pl.BlockSpec(memory_space=pltpu.MemorySpace.VMEM)
    out_pad = pl.pallas_call(
        kernel,
        out_shape=jax.ShapeDtypeStruct((n, p), jnp.float32),
        in_specs=[vmem, vmem, vmem, vmem, vmem],          # whole arrays resident in VMEM
        out_specs=vmem,                                   # lane-dense (P=128) single store
    )(adj, x_pad, w1s, w2s, vecs)

    # torch.abs(output) is a no-op after the in-kernel ReLU; just strip lane padding.
    return out_pad[:, :hidden]


def atom_feature_extractor_ref(x, edge_index, params, bn_eps=1e-5):
    """Pure-JAX reference with the same bf16-at-MXU / f32-accumulate numerics."""
    n = x.shape[0]
    adj = build_dense_adjacency(edge_index, n).astype(jnp.bfloat16)
    h = x.astype(jnp.float32)
    for pr in params:
        agg = jnp.dot(adj, h.astype(jnp.bfloat16), preferred_element_type=jnp.float32)
        h = h + agg                                        # eps = 0
        h = jnp.maximum(jnp.dot(h.astype(jnp.bfloat16), pr["w1"].astype(jnp.bfloat16),
                                preferred_element_type=jnp.float32) + pr["b1"], 0.0)
        h = jnp.dot(h.astype(jnp.bfloat16), pr["w2"].astype(jnp.bfloat16),
                    preferred_element_type=jnp.float32) + pr["b2"]
        mean = jnp.mean(h, axis=0, keepdims=True)
        var = jnp.mean((h - mean) ** 2, axis=0, keepdims=True)
        h = (h - mean) * lax.rsqrt(var + bn_eps) * pr["gamma"] + pr["beta"]
        h = jnp.maximum(h, 0.0)
    return jnp.abs(h)


# ----------------------------------- main -----------------------------------

if __name__ == "__main__":
    N_NODES = 16
    IN_DIM = 16
    HIDDEN = 32
    NUM_LAYERS = 3
    N_EDGES = 32

    key = jax.random.PRNGKey(0)
    kx, ke, kp = jax.random.split(key, 3)

    x = jax.random.normal(kx, (N_NODES, IN_DIM), jnp.float32)
    # random directed edges, made symmetric (typical molecular graph)
    e = jax.random.randint(ke, (2, N_EDGES), 0, N_NODES)
    edge_index = jnp.concatenate([e, e[::-1]], axis=1)     # [2, 2*E]

    params = init_params(kp, IN_DIM, HIDDEN, NUM_LAYERS)

    out = atom_feature_extractor(x, edge_index, params)
    out = jax.block_until_ready(out)

    ref = atom_feature_extractor_ref(x, edge_index, params)
    assert out.shape == (N_NODES, HIDDEN)
    assert jnp.allclose(out, ref, atol=2e-3, rtol=2e-3), "mismatch vs reference"

    print("KERNEL_OK")
</pallas_src>

<mosaic_0001>
module attributes {stable_mosaic.version = 11 : i64} {
  func.func @_fused_gin_kernel(%arg0: memref<16x16xbf16, #tpu.memory_space<vmem>>, %arg1: memref<16x128xf32, #tpu.memory_space<vmem>>, %arg2: memref<3x128x128xbf16, #tpu.memory_space<vmem>>, %arg3: memref<3x128x128xbf16, #tpu.memory_space<vmem>>, %arg4: memref<3x8x128xf32, #tpu.memory_space<vmem>>, %arg5: memref<16x128xf32, #tpu.memory_space<vmem>>) attributes {dimension_semantics = [], scalar_prefetch = 0 : i64, scratch_operands = 0 : i64, tpu.core_type = #tpu.core_type<tc>} {
    %c0 = arith.constant 0 : index
    %c0_0 = arith.constant 0 : index
    %0 = vector.load %arg0[%c0, %c0_0] : memref<16x16xbf16, #tpu.memory_space<vmem>>, vector<16x16xbf16>
    %c0_1 = arith.constant 0 : index
    %c0_2 = arith.constant 0 : index
    %1 = vector.load %arg1[%c0_1, %c0_2] : memref<16x128xf32, #tpu.memory_space<vmem>>, vector<16x128xf32>
    %c0_i32 = arith.constant 0 : i32
    %2 = arith.truncf %1 : vector<16x128xf32> to vector<16x128xbf16>
    %cst = arith.constant dense<0.000000e+00> : vector<16x128xf32>
    %3 = tpu.matmul %0, %2, %cst {dimension_numbers = #tpu.dot_dimension_numbers<[1], [0], [0], [1], [0, 0, 1, 1], [], []>} : vector<16x16xbf16>, vector<16x128xbf16>, vector<16x128xf32> -> vector<16x128xf32>
    %4 = arith.addf %1, %3 : vector<16x128xf32>
    %5 = arith.index_cast %c0_i32 : i32 to index
    %c0_3 = arith.constant 0 : index
    %c0_4 = arith.constant 0 : index
    %6 = vector.load %arg4[%5, %c0_3, %c0_4] : memref<3x8x128xf32, #tpu.memory_space<vmem>>, vector<1x8x128xf32>
    %7 = vector.shape_cast %6 : vector<1x8x128xf32> to vector<8x128xf32>
    %8 = vector.extract_strided_slice %7 {offsets = [0, 0], sizes = [1, 128], strides = [1, 1]} : vector<8x128xf32> to vector<1x128xf32>
    %9 = vector.extract_strided_slice %7 {offsets = [1, 0], sizes = [1, 128], strides = [1, 1]} : vector<8x128xf32> to vector<1x128xf32>
    %10 = vector.extract_strided_slice %7 {offsets = [2, 0], sizes = [1, 128], strides = [1, 1]} : vector<8x128xf32> to vector<1x128xf32>
    %11 = vector.extract_strided_slice %7 {offsets = [3, 0], sizes = [1, 128], strides = [1, 1]} : vector<8x128xf32> to vector<1x128xf32>
    %12 = arith.truncf %4 : vector<16x128xf32> to vector<16x128xbf16>
    %13 = arith.index_cast %c0_i32 : i32 to index
    %c0_5 = arith.constant 0 : index
    %c0_6 = arith.constant 0 : index
    %14 = vector.load %arg2[%13, %c0_5, %c0_6] : memref<3x128x128xbf16, #tpu.memory_space<vmem>>, vector<1x128x128xbf16>
    %15 = vector.shape_cast %14 : vector<1x128x128xbf16> to vector<128x128xbf16>
    %cst_7 = arith.constant dense<0.000000e+00> : vector<16x128xf32>
    %16 = tpu.matmul %12, %15, %cst_7 {dimension_numbers = #tpu.dot_dimension_numbers<[1], [0], [0], [1], [0, 0, 1, 1], [], []>} : vector<16x128xbf16>, vector<128x128xbf16>, vector<16x128xf32> -> vector<16x128xf32>
    %17 = vector.broadcast %8 : vector<1x128xf32> to vector<16x128xf32>
    %18 = arith.addf %16, %17 : vector<16x128xf32>
    %cst_8 = arith.constant 0.000000e+00 : f32
    %19 = vector.broadcast %cst_8 : f32 to vector<16x128xf32>
    %20 = arith.maximumf %18, %19 : vector<16x128xf32>
    %21 = arith.truncf %20 : vector<16x128xf32> to vector<16x128xbf16>
    %22 = arith.index_cast %c0_i32 : i32 to index
    %c0_9 = arith.constant 0 : index
    %c0_10 = arith.constant 0 : index
    %23 = vector.load %arg3[%22, %c0_9, %c0_10] : memref<3x128x128xbf16, #tpu.memory_space<vmem>>, vector<1x128x128xbf16>
    %24 = vector.shape_cast %23 : vector<1x128x128xbf16> to vector<128x128xbf16>
    %cst_11 = arith.constant dense<0.000000e+00> : vector<16x128xf32>
    %25 = tpu.matmul %21, %24, %cst_11 {dimension_numbers = #tpu.dot_dimension_numbers<[1], [0], [0], [1], [0, 0, 1, 1], [], []>} : vector<16x128xbf16>, vector<128x128xbf16>, vector<16x128xf32> -> vector<16x128xf32>
    %26 = vector.broadcast %9 : vector<1x128xf32> to vector<16x128xf32>
    %27 = arith.addf %25, %26 : vector<16x128xf32>
    %cst_12 = arith.constant dense<0.000000e+00> : vector<128xf32>
    %28 = vector.multi_reduction <add>, %27, %cst_12 [0] : vector<16x128xf32> to vector<128xf32>
    %29 = vector.shape_cast %28 : vector<128xf32> to vector<1x128xf32>
    %cst_13 = arith.constant 1.600000e+01 : f32
    %30 = vector.broadcast %cst_13 : f32 to vector<1x128xf32>
    %31 = arith.divf %29, %30 : vector<1x128xf32>
    %32 = vector.broadcast %31 : vector<1x128xf32> to vector<16x128xf32>
    %33 = arith.subf %27, %32 : vector<16x128xf32>
    %34 = arith.mulf %33, %33 : vector<16x128xf32>
    %cst_14 = arith.constant dense<0.000000e+00> : vector<128xf32>
    %35 = vector.multi_reduction <add>, %34, %cst_14 [0] : vector<16x128xf32> to vector<128xf32>
    %36 = vector.shape_cast %35 : vector<128xf32> to vector<1x128xf32>
    %cst_15 = arith.constant 1.600000e+01 : f32
    %37 = vector.broadcast %cst_15 : f32 to vector<1x128xf32>
    %38 = arith.divf %36, %37 : vector<1x128xf32>
    %cst_16 = arith.constant 9.99999974E-6 : f32
    %39 = vector.broadcast %cst_16 : f32 to vector<1x128xf32>
    %40 = arith.addf %38, %39 : vector<1x128xf32>
    %41 = math.rsqrt %40 : vector<1x128xf32>
    %42 = vector.broadcast %41 : vector<1x128xf32> to vector<16x128xf32>
    %43 = arith.mulf %33, %42 : vector<16x128xf32>
    %44 = vector.broadcast %10 : vector<1x128xf32> to vector<16x128xf32>
    %45 = arith.mulf %43, %44 : vector<16x128xf32>
    %46 = vector.broadcast %11 : vector<1x128xf32> to vector<16x128xf32>
    %47 = arith.addf %45, %46 : vector<16x128xf32>
    %cst_17 = arith.constant 0.000000e+00 : f32
    %48 = vector.broadcast %cst_17 : f32 to vector<16x128xf32>
    %49 = arith.maximumf %47, %48 : vector<16x128xf32>
    %c1_i32 = arith.constant 1 : i32
    %50 = arith.truncf %49 : vector<16x128xf32> to vector<16x128xbf16>
    %cst_18 = arith.constant dense<0.000000e+00> : vector<16x128xf32>
    %51 = tpu.matmul %0, %50, %cst_18 {dimension_numbers = #tpu.dot_dimension_numbers<[1], [0], [0], [1], [0, 0, 1, 1], [], []>} : vector<16x16xbf16>, vector<16x128xbf16>, vector<16x128xf32> -> vector<16x128xf32>
    %52 = arith.addf %49, %51 : vector<16x128xf32>
    %53 = arith.index_cast %c1_i32 : i32 to index
    %c0_19 = arith.constant 0 : index
    %c0_20 = arith.constant 0 : index
    %54 = vector.load %arg4[%53, %c0_19, %c0_20] : memref<3x8x128xf32, #tpu.memory_space<vmem>>, vector<1x8x128xf32>
    %55 = vector.shape_cast %54 : vector<1x8x128xf32> to vector<8x128xf32>
    %56 = vector.extract_strided_slice %55 {offsets = [0, 0], sizes = [1, 128], strides = [1, 1]} : vector<8x128xf32> to vector<1x128xf32>
    %57 = vector.extract_strided_slice %55 {offsets = [1, 0], sizes = [1, 128], strides = [1, 1]} : vector<8x128xf32> to vector<1x128xf32>
    %58 = vector.extract_strided_slice %55 {offsets = [2, 0], sizes = [1, 128], strides = [1, 1]} : vector<8x128xf32> to vector<1x128xf32>
    %59 = vector.extract_strided_slice %55 {offsets = [3, 0], sizes = [1, 128], strides = [1, 1]} : vector<8x128xf32> to vector<1x128xf32>
    %60 = arith.truncf %52 : vector<16x128xf32> to vector<16x128xbf16>
    %61 = arith.index_cast %c1_i32 : i32 to index
    %c0_21 = arith.constant 0 : index
    %c0_22 = arith.constant 0 : index
    %62 = vector.load %arg2[%61, %c0_21, %c0_22] : memref<3x128x128xbf16, #tpu.memory_space<vmem>>, vector<1x128x128xbf16>
    %63 = vector.shape_cast %62 : vector<1x128x128xbf16> to vector<128x128xbf16>
    %cst_23 = arith.constant dense<0.000000e+00> : vector<16x128xf32>
    %64 = tpu.matmul %60, %63, %cst_23 {dimension_numbers = #tpu.dot_dimension_numbers<[1], [0], [0], [1], [0, 0, 1, 1], [], []>} : vector<16x128xbf16>, vector<128x128xbf16>, vector<16x128xf32> -> vector<16x128xf32>
    %65 = vector.broadcast %56 : vector<1x128xf32> to vector<16x128xf32>
    %66 = arith.addf %64, %65 : vector<16x128xf32>
    %cst_24 = arith.constant 0.000000e+00 : f32
    %67 = vector.broadcast %cst_24 : f32 to vector<16x128xf32>
    %68 = arith.maximumf %66, %67 : vector<16x128xf32>
    %69 = arith.truncf %68 : vector<16x128xf32> to vector<16x128xbf16>
    %70 = arith.index_cast %c1_i32 : i32 to index
    %c0_25 = arith.constant 0 : index
    %c0_26 = arith.constant 0 : index
    %71 = vector.load %arg3[%70, %c0_25, %c0_26] : memref<3x128x128xbf16, #tpu.memory_space<vmem>>, vector<1x128x128xbf16>
    %72 = vector.shape_cast %71 : vector<1x128x128xbf16> to vector<128x128xbf16>
    %cst_27 = arith.constant dense<0.000000e+00> : vector<16x128xf32>
    %73 = tpu.matmul %69, %72, %cst_27 {dimension_numbers = #tpu.dot_dimension_numbers<[1], [0], [0], [1], [0, 0, 1, 1], [], []>} : vector<16x128xbf16>, vector<128x128xbf16>, vector<16x128xf32> -> vector<16x128xf32>
    %74 = vector.broadcast %57 : vector<1x128xf32> to vector<16x128xf32>
    %75 = arith.addf %73, %74 : vector<16x128xf32>
    %cst_28 = arith.constant dense<0.000000e+00> : vector<128xf32>
    %76 = vector.multi_reduction <add>, %75, %cst_28 [0] : vector<16x128xf32> to vector<128xf32>
    %77 = vector.shape_cast %76 : vector<128xf32> to vector<1x128xf32>
    %cst_29 = arith.constant 1.600000e+01 : f32
    %78 = vector.broadcast %cst_29 : f32 to vector<1x128xf32>
    %79 = arith.divf %77, %78 : vector<1x128xf32>
    %80 = vector.broadcast %79 : vector<1x128xf32> to vector<16x128xf32>
    %81 = arith.subf %75, %80 : vector<16x128xf32>
    %82 = arith.mulf %81, %81 : vector<16x128xf32>
    %cst_30 = arith.constant dense<0.000000e+00> : vector<128xf32>
    %83 = vector.multi_reduction <add>, %82, %cst_30 [0] : vector<16x128xf32> to vector<128xf32>
    %84 = vector.shape_cast %83 : vector<128xf32> to vector<1x128xf32>
    %cst_31 = arith.constant 1.600000e+01 : f32
    %85 = vector.broadcast %cst_31 : f32 to vector<1x128xf32>
    %86 = arith.divf %84, %85 : vector<1x128xf32>
    %cst_32 = arith.constant 9.99999974E-6 : f32
    %87 = vector.broadcast %cst_32 : f32 to vector<1x128xf32>
    %88 = arith.addf %86, %87 : vector<1x128xf32>
    %89 = math.rsqrt %88 : vector<1x128xf32>
    %90 = vector.broadcast %89 : vector<1x128xf32> to vector<16x128xf32>
    %91 = arith.mulf %81, %90 : vector<16x128xf32>
    %92 = vector.broadcast %58 : vector<1x128xf32> to vector<16x128xf32>
    %93 = arith.mulf %91, %92 : vector<16x128xf32>
    %94 = vector.broadcast %59 : vector<1x128xf32> to vector<16x128xf32>
    %95 = arith.addf %93, %94 : vector<16x128xf32>
    %cst_33 = arith.constant 0.000000e+00 : f32
    %96 = vector.broadcast %cst_33 : f32 to vector<16x128xf32>
    %97 = arith.maximumf %95, %96 : vector<16x128xf32>
    %c2_i32 = arith.constant 2 : i32
    %98 = arith.truncf %97 : vector<16x128xf32> to vector<16x128xbf16>
    %cst_34 = arith.constant dense<0.000000e+00> : vector<16x128xf32>
    %99 = tpu.matmul %0, %98, %cst_34 {dimension_numbers = #tpu.dot_dimension_numbers<[1], [0], [0], [1], [0, 0, 1, 1], [], []>} : vector<16x16xbf16>, vector<16x128xbf16>, vector<16x128xf32> -> vector<16x128xf32>
    %100 = arith.addf %97, %99 : vector<16x128xf32>
    %101 = arith.index_cast %c2_i32 : i32 to index
    %c0_35 = arith.constant 0 : index
    %c0_36 = arith.constant 0 : index
    %102 = vector.load %arg4[%101, %c0_35, %c0_36] : memref<3x8x128xf32, #tpu.memory_space<vmem>>, vector<1x8x128xf32>
    %103 = vector.shape_cast %102 : vector<1x8x128xf32> to vector<8x128xf32>
    %104 = vector.extract_strided_slice %103 {offsets = [0, 0], sizes = [1, 128], strides = [1, 1]} : vector<8x128xf32> to vector<1x128xf32>
    %105 = vector.extract_strided_slice %103 {offsets = [1, 0], sizes = [1, 128], strides = [1, 1]} : vector<8x128xf32> to vector<1x128xf32>
    %106 = vector.extract_strided_slice %103 {offsets = [2, 0], sizes = [1, 128], strides = [1, 1]} : vector<8x128xf32> to vector<1x128xf32>
    %107 = vector.extract_strided_slice %103 {offsets = [3, 0], sizes = [1, 128], strides = [1, 1]} : vector<8x128xf32> to vector<1x128xf32>
    %108 = arith.truncf %100 : vector<16x128xf32> to vector<16x128xbf16>
    %109 = arith.index_cast %c2_i32 : i32 to index
    %c0_37 = arith.constant 0 : index
    %c0_38 = arith.constant 0 : index
    %110 = vector.load %arg2[%109, %c0_37, %c0_38] : memref<3x128x128xbf16, #tpu.memory_space<vmem>>, vector<1x128x128xbf16>
    %111 = vector.shape_cast %110 : vector<1x128x128xbf16> to vector<128x128xbf16>
    %cst_39 = arith.constant dense<0.000000e+00> : vector<16x128xf32>
    %112 = tpu.matmul %108, %111, %cst_39 {dimension_numbers = #tpu.dot_dimension_numbers<[1], [0], [0], [1], [0, 0, 1, 1], [], []>} : vector<16x128xbf16>, vector<128x128xbf16>, vector<16x128xf32> -> vector<16x128xf32>
    %113 = vector.broadcast %104 : vector<1x128xf32> to vector<16x128xf32>
    %114 = arith.addf %112, %113 : vector<16x128xf32>
    %cst_40 = arith.constant 0.000000e+00 : f32
    %115 = vector.broadcast %cst_40 : f32 to vector<16x128xf32>
    %116 = arith.maximumf %114, %115 : vector<16x128xf32>
    %117 = arith.truncf %116 : vector<16x128xf32> to vector<16x128xbf16>
    %118 = arith.index_cast %c2_i32 : i32 to index
    %c0_41 = arith.constant 0 : index
    %c0_42 = arith.constant 0 : index
    %119 = vector.load %arg3[%118, %c0_41, %c0_42] : memref<3x128x128xbf16, #tpu.memory_space<vmem>>, vector<1x128x128xbf16>
    %120 = vector.shape_cast %119 : vector<1x128x128xbf16> to vector<128x128xbf16>
    %cst_43 = arith.constant dense<0.000000e+00> : vector<16x128xf32>
    %121 = tpu.matmul %117, %120, %cst_43 {dimension_numbers = #tpu.dot_dimension_numbers<[1], [0], [0], [1], [0, 0, 1, 1], [], []>} : vector<16x128xbf16>, vector<128x128xbf16>, vector<16x128xf32> -> vector<16x128xf32>
    %122 = vector.broadcast %105 : vector<1x128xf32> to vector<16x128xf32>
    %123 = arith.addf %121, %122 : vector<16x128xf32>
    %cst_44 = arith.constant dense<0.000000e+00> : vector<128xf32>
    %124 = vector.multi_reduction <add>, %123, %cst_44 [0] : vector<16x128xf32> to vector<128xf32>
    %125 = vector.shape_cast %124 : vector<128xf32> to vector<1x128xf32>
    %cst_45 = arith.constant 1.600000e+01 : f32
    %126 = vector.broadcast %cst_45 : f32 to vector<1x128xf32>
    %127 = arith.divf %125, %126 : vector<1x128xf32>
    %128 = vector.broadcast %127 : vector<1x128xf32> to vector<16x128xf32>
    %129 = arith.subf %123, %128 : vector<16x128xf32>
    %130 = arith.mulf %129, %129 : vector<16x128xf32>
    %cst_46 = arith.constant dense<0.000000e+00> : vector<128xf32>
    %131 = vector.multi_reduction <add>, %130, %cst_46 [0] : vector<16x128xf32> to vector<128xf32>
    %132 = vector.shape_cast %131 : vector<128xf32> to vector<1x128xf32>
    %cst_47 = arith.constant 1.600000e+01 : f32
    %133 = vector.broadcast %cst_47 : f32 to vector<1x128xf32>
    %134 = arith.divf %132, %133 : vector<1x128xf32>
    %cst_48 = arith.constant 9.99999974E-6 : f32
    %135 = vector.broadcast %cst_48 : f32 to vector<1x128xf32>
    %136 = arith.addf %134, %135 : vector<1x128xf32>
    %137 = math.rsqrt %136 : vector<1x128xf32>
    %138 = vector.broadcast %137 : vector<1x128xf32> to vector<16x128xf32>
    %139 = arith.mulf %129, %138 : vector<16x128xf32>
    %140 = vector.broadcast %106 : vector<1x128xf32> to vector<16x128xf32>
    %141 = arith.mulf %139, %140 : vector<16x128xf32>
    %142 = vector.broadcast %107 : vector<1x128xf32> to vector<16x128xf32>
    %143 = arith.addf %141, %142 : vector<16x128xf32>
    %cst_49 = arith.constant 0.000000e+00 : f32
    %144 = vector.broadcast %cst_49 : f32 to vector<16x128xf32>
    %145 = arith.maximumf %143, %144 : vector<16x128xf32>
    %c3_i32 = arith.constant 3 : i32
    %c0_50 = arith.constant 0 : index
    %c0_51 = arith.constant 0 : index
    %146 = vector.load %arg5[%c0_50, %c0_51] : memref<16x128xf32, #tpu.memory_space<vmem>>, vector<16x128xf32>
    tpu.vector_store %arg5[%c0_50, %c0_51], %145 {strides = array<i32>} : memref<16x128xf32, #tpu.memory_space<vmem>>, vector<16x128xf32>,
    return
  }
}

</mosaic_0001>

<bundles_post_ra>
// kernel: tpu_custom_call.1
= control target key start
LH: loop header
LB: loop body
LE: loop exit
PB: predicated region body
PF: predicated region fallthrough
CT: control target
= control target key end

     0   :  { %10 = vsyncpa [#allocation3], 0  ;;  %s1675_s0 = inlined_call_operand.hbm [shape: bf16[16,16], index: 0, kind: input, shape index: {}]   ;;  %s1676_s1 = inlined_call_operand.hbm [shape: f32[16,128], index: 1, kind: input, shape index: {}]   ;;  %s1677_s2 = inlined_call_operand.hbm [shape: bf16[3,128,128], index: 2, kind: input, shape index: {}]   ;;  %s1678_s3 = inlined_call_operand.hbm [shape: bf16[3,128,128], index: 3, kind: input, shape index: {}]   ;;  %s1679_s4 = inlined_call_operand.hbm [shape: f32[3,8,128], index: 4, kind: input, shape index: {}]   ;;  %s1680_s5 = inlined_call_operand.hbm [shape: f32[16,128], index: 5, kind: output, shape index: {}]  }
   0x1   :  { %11 = vsyncpa [#allocation6], 0 }
   0x2   :  { %12 = vsyncpa [#allocation9], 0 }
   0x3   :  { %13 = vsyncpa [#allocation4], 0  ;;  %s1491_s18 = smov [#allocation5]  }
   0x4   :  { %s31_s19 = sshll.u32 %s1491_s18, 4  ;;  %s32_s19 = int_to_ptr.vmem [resolvable:$true] %s31_s19 }
   0x5   :  { %s1371_s20 = scalar_lea.vmem %s32_s19, 256  ;;  %p1376_p1 = scmp.lt.s32.totalorder %s32_s19, %s32_s19 }
   0x6   :  { %p1372_p0 = scmp.ne.s32.totalorder %s32_s19, %s1371_s20  ;;  %p1377_p2 = scmp.lt.s32.totalorder %s1371_s20, %s1371_s20 }
   0x8   :  { %p1378_p3 = por %p1377_p2, %p1376_p1 }
   0xa   :  { %p1379_p4 = pnand %p1378_p3, %p1372_p0 }
   0xc   :  { %1382 = shalt.err (!%p1379_p4)
}
   0xd   :  { %s1492_s21 = smov 128   ;;  %s1493_s22 = smov 8  }
   0xe   :  { %37 = dma.hbm_to_vmem [thread:$0]  %s1676_s1, 256, %s32_s19, [#allocation6], %s1492_s21, %s1492_s21, %s1493_s22  }
   0xf   :  { %s1494_s25 = smov [#allocation8]   ;;  %s1495_s27 = smov [#allocation2]  }
  0x10   :  { %s55_s26 = sshll.u32 %s1494_s25, 4  ;;  %s19_s28 = sshll.u32 %s1495_s27, 4  ;;  %s56_s26 = int_to_ptr.vmem [resolvable:$true] %s55_s26  ;;  %s20_s28 = int_to_ptr.vmem [resolvable:$true] %s19_s28 }
  0x11   :  { %s1391_s29 = scalar_lea.vmem %s56_s26, 3072  ;;  %p1396_p6 = scmp.lt.s32.totalorder %s56_s26, %s56_s26 }
  0x12   :  { %p1392_p5 = scmp.ne.s32.totalorder %s56_s26, %s1391_s29  ;;  %p1397_p7 = scmp.lt.s32.totalorder %s1391_s29, %s1391_s29 }
  0x14   :  { %p1398_p8 = por %p1397_p7, %p1396_p6 }
  0x16   :  { %p1399_p9 = pnand %p1398_p8, %p1392_p5 }
  0x18   :  { %1402 = shalt.err (!%p1399_p9)
}
  0x19   :  { %s1496_s30 = smov 64   ;;  %s1497_s6 = smov 4  }
  0x1a   :  { %61 = dma.hbm_to_vmem [thread:$0]  %s1678_s3, 3072, %s56_s26, [#allocation9], %s1496_s30, %s1496_s30, %s1497_s6  }
  0x1b   :  { %s1411_s1 = scalar_lea.vmem %s20_s28, 128  ;;  %p1416_p11 = scmp.lt.s32.totalorder %s20_s28, %s20_s28 }
  0x1c   :  { %p1412_p10 = scmp.ne.s32.totalorder %s20_s28, %s1411_s1  ;;  %p1417_p12 = scmp.lt.s32.totalorder %s1411_s1, %s1411_s1 }
  0x1e   :  { %p1418_p13 = por %p1417_p12, %p1416_p11 }
  0x20   :  { %p1419_p0 = pnand %p1418_p13, %p1412_p10 }
  0x22   :  { %1422 = shalt.err (!%p1419_p0)
}
  0x23   :  { %25 = dma.hbm_to_vmem [thread:$0]  %s1675_s0, 128, %s20_s28, [#allocation3], %s1496_s30, %s1496_s30, %s1497_s6  }
  0x24   :  { %s1498_s11 = smov [#allocation7]   ;;  %s1499_s13 = smov [#allocation10]  }
  0x25   :  { %s43_s12 = sshll.u32 %s1498_s11, 4  ;;  %s67_s14 = sshll.u32 %s1499_s13, 4  ;;  %s44_s12 = int_to_ptr.vmem [resolvable:$true] %s43_s12  ;;  %s68_s14 = int_to_ptr.vmem [resolvable:$true] %s67_s14 }
  0x26   :  { %s1431_s15 = scalar_lea.vmem %s44_s12, 3072  ;;  %p1436_p2 = scmp.lt.s32.totalorder %s44_s12, %s44_s12 }
  0x27   :  { %p1432_p1 = scmp.ne.s32.totalorder %s44_s12, %s1431_s15  ;;  %p1437_p3 = scmp.lt.s32.totalorder %s1431_s15, %s1431_s15 }
  0x29   :  { %p1438_p4 = por %p1437_p3, %p1436_p2 }
  0x2b   :  { %p1439_p5 = pnand %p1438_p4, %p1432_p1 }
  0x2d   :  { %1442 = shalt.err (!%p1439_p5)
}
  0x2e   :  { %49 = dma.hbm_to_vmem [thread:$0]  %s1677_s2, 3072, %s44_s12, [#allocation6], %s1496_s30, %s1496_s30, %s1497_s6  }
  0x2f   :  { %s1451_s17 = scalar_lea.vmem %s68_s14, 384  ;;  %p1456_p7 = scmp.lt.s32.totalorder %s68_s14, %s68_s14 }
  0x30   :  { %p1452_p6 = scmp.ne.s32.totalorder %s68_s14, %s1451_s17  ;;  %p1457_p8 = scmp.lt.s32.totalorder %s1451_s17, %s1451_s17 }
  0x32   :  { %p1458_p9 = por %p1457_p8, %p1456_p7 }
  0x34   :  { %p1459_p10 = pnand %p1458_p9, %p1452_p6 }
  0x36   :  { %1462 = shalt.err (!%p1459_p10)
}
  0x37   :  { %73 = dma.hbm_to_vmem [thread:$0]  %s1679_s4, 384, %s68_s14, [#allocation9], %s1492_s21, %s1492_s21, %s1493_s22  }
  0x38   :  { %1483 = dma.done.wait [#allocation3], 128  }
  0x39   :  { %1484 = vsyncadd [#allocation3], 4294967168 }
  0x3a   :  { %1485 = dma.done.wait [#allocation6], 3328  }
  0x3b   :  { %1486 = vsyncadd [#allocation6], 4294963968 }
  0x3c   :  { %1487 = dma.done.wait [#allocation9], 3456  }
  0x3d   :  { %1488 = vsyncadd [#allocation9], 4294963840  ;;  %v1500_v0 = vmov 0.0   ;;  %vm1501_vm0 = vmmov 0   ;;  %v92_v1 = vld [vmem:[#allocation5] sm:$0xff]  ;;  %v93_v2 = vld [vmem:[#allocation5 + $0x8] sm:$0xff]  ;;  %v165_v28 = vlaneseq }
  0x3e   :  { %1158 = vmatprep.subr.bf16.mxu0 %v1500_v0  ;;  %1160 = vmatprep.mubr.msk.bf16.mxu0 %vm1501_vm0, %v1500_v0  ;;  %v94_v3 = vpack.c.bf16 %v93_v2, %v92_v1  ;;  %v1560_v4 = vld [vmem:[#allocation2] sm:$0xff]   ;;  %v1309_v5 = vld [vmem:[#allocation7 + $0x38] sm:$0xff]   ;;  %vm100_vm1 = vcmask 130048   ;;  %v1310_v6 = vld [vmem:[#allocation7 + $0x30] sm:$0xff]   ;;  %s1502_s2 = smov [#allocation11]  }
  0x3f   :  { %1164 = vmatprep.subr.bf16.mxu1 %v1500_v0  ;;  %1180 = vmatprep.mubr.msk.bf16.mxu1 %vm1501_vm0, %v1500_v0  ;;  %v1311_v7 = vld [vmem:[#allocation7 + $0x28] sm:$0xff]   ;;  %v1312_v8 = vld [vmem:[#allocation7 + $0x20] sm:$0xff]   ;;  %v1313_v9 = vld [vmem:[#allocation7 + $0x18] sm:$0xff]   ;;  %v1585_v29 = vshrl.u32 %v165_v28, 7  ;;  %s1032_s4 = sshll.u32 %s1502_s2, 4  ;;  %s1033_s4 = int_to_ptr.vmem [resolvable:$true] %s1032_s4 }
  0x40   :  { %1159 = vmatpush3.bf16.msra.mxu0 %v94_v3  ;;  %1165 = vmatpush3.bf16.msra.mxu1 %v1309_v5  ;;  %v1314_v10 = vld [vmem:[#allocation7 + $0x10] sm:$0xff]   ;;  %v1315_v11 = vld [vmem:[#allocation7 + $0x8] sm:$0xff]   ;;  %v1316_v12 = vld [vmem:[#allocation7] sm:$0xff]   ;;  %s1463_s19 = scalar_lea.vmem %s1033_s4, 256  ;;  %p1468_p12 = scmp.lt.s32.totalorder %s1033_s4, %s1033_s4 }
  0x41   :  { %1184 = vmatprep.subr.bf16.mxu0 %v1500_v0  ;;  %1166 = vmatprep.subr.bf16.mxu1 %v1500_v0  ;;  %v1317_v13 = vld [vmem:[#allocation8 + $0x38] sm:$0xff]   ;;  %v1318_v14 = vld [vmem:[#allocation8 + $0x30] sm:$0xff]   ;;  %v1319_v15 = vld [vmem:[#allocation8 + $0x28] sm:$0xff]   ;;  %v1588_v30 = vsub.s32 0, %v1585_v29  ;;  %v1603_v48 = vsub.s32 1, %v1585_v29  ;;  %p1464_p11 = scmp.ne.s32.totalorder %s1033_s4, %s1463_s19  ;;  %p1469_p13 = scmp.lt.s32.totalorder %s1463_s19, %s1463_s19 }
  0x42   :  { %v1320_v16 = vld [vmem:[#allocation8 + $0x20] sm:$0xff]   ;;  %v1321_v17 = vld [vmem:[#allocation8 + $0x18] sm:$0xff]   ;;  %v1322_v25 = vld [vmem:[#allocation8 + $0x10] sm:$0xff]  }
  0x43   :  { %1161 = vmatmul.mubr.msk.bf16.vlgmr.msra.gmra.mxu0 %vm100_vm1, %v1560_v4  ;;  %v1323_v26 = vld [vmem:[#allocation8 + $0x8] sm:$0xff]   ;;  %v1324_v27 = vld [vmem:[#allocation8] sm:$0xff]   ;;  %v1325_v42 = vld [vmem:[#allocation7 + $0x78] sm:$0xff]   ;;  %p1470_p0 = por %p1469_p13, %p1468_p12 }
  0x44   :  { %1200 = vmatprep.mubr.msk.bf16.mxu0 %vm1501_vm0, %v1500_v0  ;;  %1167 = vmatpush3.bf16.msra.mxu1 %v1310_v6  ;;  %v1590_v31 = vld [vmem:[#allocation10] sm:$0xff]  ;;  %v1326_v43 = vld [vmem:[#allocation7 + $0x70] sm:$0xff]   ;;  %v1327_v44 = vld [vmem:[#allocation7 + $0x68] sm:$0xff]  }
  0x45   :  { %1168 = vmatprep.subr.bf16.mxu1 %v1500_v0  ;;  %1185 = vmatpush3.bf16.msra.mxu0 %v1317_v13  ;;  %v168_v32 = vrot.slane %v1590_v31, %v1588_v30  ;;  %v1328_v45 = vld [vmem:[#allocation7 + $0x60] sm:$0xff]   ;;  %v1329_v46 = vld [vmem:[#allocation7 + $0x58] sm:$0xff]   ;;  %v1330_v47 = vld [vmem:[#allocation7 + $0x50] sm:$0xff]   ;;  %v280_v50 = vrot.slane %v1590_v31, %v1603_v48  ;;  %p1471_p1 = pnand %p1470_p0, %p1464_p11 }
  0x46   :  { %1186 = vmatprep.subr.bf16.mxu0 %v1500_v0 }
  0x48   :  { %1169 = vmatpush3.bf16.msra.mxu1 %v1311_v7 }
  0x49   :  { %1170 = vmatprep.subr.bf16.mxu1 %v1500_v0  ;;  %1187 = vmatpush3.bf16.msra.mxu0 %v1318_v14 }
  0x4a   :  { %1188 = vmatprep.subr.bf16.mxu0 %v1500_v0 }
  0x4c   :  { %1171 = vmatpush3.bf16.msra.mxu1 %v1312_v8 }
  0x4d   :  { %1172 = vmatprep.subr.bf16.mxu1 %v1500_v0  ;;  %1189 = vmatpush3.bf16.msra.mxu0 %v1319_v15  ;;  %v1608_v15 = vsub.s32 2, %v1585_v29 }
  0x4e   :  { %1190 = vmatprep.subr.bf16.mxu0 %v1500_v0 }
  0x50   :  { %1173 = vmatpush3.bf16.msra.mxu1 %v1313_v9 }
  0x51   :  { %1174 = vmatprep.subr.bf16.mxu1 %v1500_v0  ;;  %1191 = vmatpush3.bf16.msra.mxu0 %v1320_v16  ;;  %v1611_v16 = vsub.s32 3, %v1585_v29  ;;  %v1331_v29 = vld [vmem:[#allocation7 + $0x48] sm:$0xff]  }
  0x52   :  { %1192 = vmatprep.subr.bf16.mxu0 %v1500_v0 }
  0x54   :  { %1175 = vmatpush3.bf16.msra.mxu1 %v1314_v10 }
  0x55   :  { %1176 = vmatprep.subr.bf16.mxu1 %v1500_v0  ;;  %1193 = vmatpush3.bf16.msra.mxu0 %v1321_v17  ;;  %v398_v17 = vrot.slane %v1590_v31, %v1608_v15 }
  0x56   :  { %1194 = vmatprep.subr.bf16.mxu0 %v1500_v0 }
  0x58   :  { %1177 = vmatpush3.bf16.msra.mxu1 %v1315_v11 }
  0x59   :  { %1178 = vmatprep.subr.bf16.mxu1 %v1500_v0  ;;  %1195 = vmatpush3.bf16.msra.mxu0 %v1322_v25 }
  0x5a   :  { %1196 = vmatprep.subr.bf16.mxu0 %v1500_v0 }
  0x5c   :  { %1179 = vmatpush3.bf16.msra.mxu1 %v1316_v12 }
  0x5d   :  { %1204 = vmatprep.subr.bf16.mxu1 %v1500_v0  ;;  %1197 = vmatpush3.bf16.msra.mxu0 %v1323_v26 }
  0x5e   :  { %1198 = vmatprep.subr.bf16.mxu0 %v1500_v0 }
  0x61   :  { %1199 = vmatpush3.bf16.msra.mxu0 %v1324_v27 }
  0x62   :  { %1210 = vmatprep.subr.bf16.mxu0 %v1500_v0 }
 0x103   :  { %v138_v18 = vpop.f32.mrf.mxu0 }
 0x104   :  { %v145_v21 = vadd.f32 %v138_v18, %v92_v1 }
 0x105   :  { %v1162_v19 = vpop.f32.mrf.mxu0 }
 0x107   :  { %v141_v20 = vpop.f32.mrf.mxu0 }
 0x108   :  { %v146_v22 = vadd.f32 %v141_v20, %v93_v2 }
 0x109   :  { %v1163_v23 = vpop.f32.mrf.mxu0 }
 0x10a   :  { %v148_v24 = vpack.c.bf16 %v146_v22, %v145_v21  ;;  %v404_v21 = vrot.slane %v1590_v31, %v1611_v16  ;;  %v1332_v31 = vld [vmem:[#allocation7 + $0x40] sm:$0xff]  }
 0x10c   :  { %1181 = vmatmul.mubr.bf16.vlgmr.msra.gmra.mxu1 %v148_v24 }
 0x10d   :  { %1206 = vmatprep.mubr.msk.bf16.mxu1 %vm1501_vm0, %v1500_v0 }
 0x1cc   :  { %v251_v33 = vpop.f32.mrf.mxu1 }
 0x1cd   :  { %v252_v35 = vadd.f32 %v251_v33, %v168_v32  ;;  %v1334_v33 = vld [vmem:[#allocation8 + $0x70] sm:$0xff]  }
 0x1ce   :  { %v1182_v34 = vpop.f32.mrf.mxu1 }
 0x1cf   :  { %v258_v39 = vmax.f32 %v252_v35, 0.0  ;;  %v1335_v34 = vld [vmem:[#allocation8 + $0x68] sm:$0xff]   ;;  %v1336_v35 = vld [vmem:[#allocation8 + $0x60] sm:$0xff]  }
 0x1d0   :  { %v254_v36 = vpop.f32.mrf.mxu1 }
 0x1d1   :  { %v255_v37 = vadd.f32 %v254_v36, %v168_v32  ;;  %v1333_v32 = vld [vmem:[#allocation8 + $0x78] sm:$0xff]  }
 0x1d2   :  { %v1183_v38 = vpop.f32.mrf.mxu1  ;;  %v1337_v36 = vld [vmem:[#allocation8 + $0x58] sm:$0xff]  }
 0x1d3   :  { %v259_v40 = vmax.f32 %v255_v37, 0.0 }
 0x1d5   :  { %v260_v41 = vpack.c.bf16 %v259_v40, %v258_v39 }
 0x1d7   :  { %1201 = vmatmul.mubr.bf16.vlgmr.msra.gmra.mxu0 %v260_v41 }
 0x1d8   :  { %1226 = vmatprep.mubr.msk.bf16.mxu0 %vm1501_vm0, %v1500_v0  ;;  %1211 = vmatpush3.bf16.msra.mxu0 %v1325_v42 }
 0x1d9   :  { %1212 = vmatprep.subr.bf16.mxu0 %v1500_v0 }
 0x1dc   :  { %1213 = vmatpush3.bf16.msra.mxu0 %v1326_v43 }
 0x1dd   :  { %1214 = vmatprep.subr.bf16.mxu0 %v1500_v0 }
 0x1e0   :  { %1215 = vmatpush3.bf16.msra.mxu0 %v1327_v44  ;;  %v1338_v44 = vld [vmem:[#allocation8 + $0x50] sm:$0xff]  }
 0x1e1   :  { %1216 = vmatprep.subr.bf16.mxu0 %v1500_v0 }
 0x1e4   :  { %1217 = vmatpush3.bf16.msra.mxu0 %v1328_v45  ;;  %v1339_v45 = vld [vmem:[#allocation8 + $0x48] sm:$0xff]  }
 0x1e5   :  { %1218 = vmatprep.subr.bf16.mxu0 %v1500_v0 }
 0x1e8   :  { %1219 = vmatpush3.bf16.msra.mxu0 %v1329_v46  ;;  %v1340_v46 = vld [vmem:[#allocation8 + $0x40] sm:$0xff]  }
 0x1e9   :  { %1220 = vmatprep.subr.bf16.mxu0 %v1500_v0 }
 0x1ec   :  { %1221 = vmatpush3.bf16.msra.mxu0 %v1330_v47  ;;  %v1634_v47 = vld [vmem:[#allocation10 + $0x8] sm:$0xff] }
 0x1ed   :  { %1222 = vmatprep.subr.bf16.mxu0 %v1500_v0 }
 0x1f0   :  { %1223 = vmatpush3.bf16.msra.mxu0 %v1331_v29 }
 0x1f1   :  { %1224 = vmatprep.subr.bf16.mxu0 %v1500_v0 }
 0x1f4   :  { %1225 = vmatpush3.bf16.msra.mxu0 %v1332_v31 }
 0x1f5   :  { %1250 = vmatprep.subr.bf16.mxu0 %v1500_v0 }
 0x297   :  { %v363_v49 = vpop.f32.mrf.mxu0 }
 0x298   :  { %v364_v53 = vadd.f32 %v363_v49, %v280_v50  ;;  %v476_v49 = vrot.slane %v1634_v47, %v1588_v30 }
 0x299   :  { %v1202_v51 = vpop.f32.mrf.mxu0 }
 0x29b   :  { %v366_v52 = vpop.f32.mrf.mxu0 }
 0x29c   :  { %v367_v54 = vadd.f32 %v366_v52, %v280_v50 }
 0x29d   :  { %v1203_v55 = vpop.f32.mrf.mxu0 }
 0x29e   :  { %v370_v56 = vadd.f32 %v367_v54, %v364_v53 }
 0x2a0   :  { %v371_v57 = vrot.slane %v370_v56, 4 }
 0x2a2   :  { %v372_v58 = vadd.f32 %v371_v57, %v370_v56 }
 0x2a4   :  { %v373_v59 = vrot.slane %v372_v58, 2 }
 0x2a6   :  { %v374_v60 = vadd.f32 %v373_v59, %v372_v58  ;;  %v1341_v59 = vld [vmem:[#allocation7 + $0xb8] sm:$0xff]  }
 0x2a8   :  { %v375_v61 = vrot.slane %v374_v60, 1 }
 0x2aa   :  { %v376_v62 = vadd.f32 %v375_v61, %v374_v60  ;;  %v1342_v60 = vld [vmem:[#allocation7 + $0xb0] sm:$0xff]   ;;  %v1343_v61 = vld [vmem:[#allocation7 + $0xa8] sm:$0xff]  }
 0x2ac   :  { %v378_v63 = vmul.f32 0.0625, %v376_v62  ;;  %v1344_v62 = vld [vmem:[#allocation7 + $0xa0] sm:$0xff]  }
 0x2ae   :  { %v379_v1 = vsub.f32 %v364_v53, %v378_v63  ;;  %v380_v2 = vsub.f32 %v367_v54, %v378_v63  ;;  %v1345_v63 = vld [vmem:[#allocation7 + $0x98] sm:$0xff]  }
 0x2b0   :  { %v381_v3 = vmul.f32 %v379_v1, %v379_v1  ;;  %v382_v5 = vmul.f32 %v380_v2, %v380_v2 }
 0x2b2   :  { %v383_v6 = vadd.f32 %v382_v5, %v381_v3  ;;  %v589_v3 = vrot.slane %v1634_v47, %v1603_v48 }
 0x2b4   :  { %v384_v7 = vrot.slane %v383_v6, 4 }
 0x2b6   :  { %v385_v8 = vadd.f32 %v384_v7, %v383_v6 }
 0x2b8   :  { %v386_v9 = vrot.slane %v385_v8, 2 }
 0x2ba   :  { %v387_v10 = vadd.f32 %v386_v9, %v385_v8 }
 0x2bc   :  { %v388_v11 = vrot.slane %v387_v10, 1 }
 0x2be   :  { %v389_v12 = vadd.f32 %v388_v11, %v387_v10 }
 0x2c0   :  { %v390_v13 = vmul.f32 0.0625, %v389_v12 }
 0x2c2   :  { %v391_v14 = vadd.f32 1e-05, %v390_v13 }
 0x2c4   :  { %1357 = vrsqrt.f32 %v391_v14 }
 0x2d1   :  { %v1358_v18 = vpop.eup %1357 }
 0x2d2   :  { %v393_v19 = vmul.f32 %v1358_v18, %v379_v1  ;;  %v394_v20 = vmul.f32 %v1358_v18, %v380_v2  ;;  %v1346_v1 = vld [vmem:[#allocation7 + $0x90] sm:$0xff]  }
 0x2d4   :  { %v399_v22 = vmul.f32 %v398_v17, %v393_v19  ;;  %v400_v23 = vmul.f32 %v398_v17, %v394_v20 }
 0x2d6   :  { %v406_v24 = vadd.f32 %v404_v21, %v400_v23  ;;  %v405_v25 = vadd.f32 %v404_v21, %v399_v22 }
 0x2d8   :  { %v408_v26 = vmax.f32 %v406_v24, 0.0  ;;  %v407_v27 = vmax.f32 %v405_v25, 0.0 }
 0x2da   :  { %v409_v28 = vpack.c.bf16 %v408_v26, %v407_v27 }
 0x2dc   :  { %1205 = vmatpush3.bf16.msra.mxu1 %v409_v28 }
 0x2dd   :  { %1230 = vmatprep.subr.bf16.mxu1 %v1500_v0 }
 0x2df   :  { %1207 = vmatmul.mubr.msk.bf16.vlgmr.msra.gmra.mxu1 %vm100_vm1, %v1560_v4 }
 0x2e0   :  { %1246 = vmatprep.mubr.msk.bf16.mxu1 %vm1501_vm0, %v1500_v0  ;;  %1231 = vmatpush3.bf16.msra.mxu1 %v1333_v32 }
 0x2e1   :  { %1232 = vmatprep.subr.bf16.mxu1 %v1500_v0 }
 0x2e4   :  { %1233 = vmatpush3.bf16.msra.mxu1 %v1334_v33 }
 0x2e5   :  { %1234 = vmatprep.subr.bf16.mxu1 %v1500_v0 }
 0x2e8   :  { %1235 = vmatpush3.bf16.msra.mxu1 %v1335_v34  ;;  %v706_v34 = vrot.slane %v1634_v47, %v1608_v15 }
 0x2e9   :  { %1236 = vmatprep.subr.bf16.mxu1 %v1500_v0 }
 0x2ec   :  { %1237 = vmatpush3.bf16.msra.mxu1 %v1336_v35 }
 0x2ed   :  { %1238 = vmatprep.subr.bf16.mxu1 %v1500_v0 }
 0x2f0   :  { %1239 = vmatpush3.bf16.msra.mxu1 %v1337_v36 }
 0x2f1   :  { %1240 = vmatprep.subr.bf16.mxu1 %v1500_v0 }
 0x2f4   :  { %1241 = vmatpush3.bf16.msra.mxu1 %v1338_v44 }
 0x2f5   :  { %1242 = vmatprep.subr.bf16.mxu1 %v1500_v0 }
 0x2f8   :  { %1243 = vmatpush3.bf16.msra.mxu1 %v1339_v45 }
 0x2f9   :  { %1244 = vmatprep.subr.bf16.mxu1 %v1500_v0 }
 0x2fc   :  { %1245 = vmatpush3.bf16.msra.mxu1 %v1340_v46  ;;  %v1347_v46 = vld [vmem:[#allocation7 + $0x88] sm:$0xff]  }
 0x2fd   :  { %1256 = vmatprep.subr.bf16.mxu1 %v1500_v0 }
 0x39f   :  { %v444_v37 = vpop.f32.mrf.mxu1 }
 0x3a0   :  { %v451_v40 = vadd.f32 %v444_v37, %v407_v27 }
 0x3a1   :  { %v1208_v38 = vpop.f32.mrf.mxu1 }
 0x3a2   :  { %v712_v38 = vrot.slane %v1634_v47, %v1611_v16  ;;  %v1348_v47 = vld [vmem:[#allocation7 + $0x80] sm:$0xff]  }
 0x3a3   :  { %v447_v39 = vpop.f32.mrf.mxu1 }
 0x3a4   :  { %v452_v41 = vadd.f32 %v447_v39, %v408_v26 }
 0x3a5   :  { %v1209_v42 = vpop.f32.mrf.mxu1 }
 0x3a6   :  { %v455_v43 = vpack.c.bf16 %v452_v41, %v451_v40 }
 0x3a8   :  { %1227 = vmatmul.mubr.bf16.vlgmr.msra.gmra.mxu0 %v455_v43 }
 0x3a9   :  { %1252 = vmatprep.mubr.msk.bf16.mxu0 %vm1501_vm0, %v1500_v0 }
 0x468   :  { %v559_v50 = vpop.f32.mrf.mxu0 }
 0x469   :  { %v560_v52 = vadd.f32 %v559_v50, %v476_v49  ;;  %v1350_v50 = vld [vmem:[#allocation8 + $0xb0] sm:$0xff]  }
 0x46a   :  { %v1228_v51 = vpop.f32.mrf.mxu0 }
 0x46b   :  { %v566_v56 = vmax.f32 %v560_v52, 0.0  ;;  %v1351_v51 = vld [vmem:[#allocation8 + $0xa8] sm:$0xff]   ;;  %v1353_v52 = vld [vmem:[#allocation8 + $0x98] sm:$0xff]  }
 0x46c   :  { %v562_v53 = vpop.f32.mrf.mxu0 }
 0x46d   :  { %v563_v54 = vadd.f32 %v562_v53, %v476_v49  ;;  %v1349_v49 = vld [vmem:[#allocation8 + $0xb8] sm:$0xff]  }
 0x46e   :  { %v1229_v55 = vpop.f32.mrf.mxu0 }
 0x46f   :  { %v567_v57 = vmax.f32 %v563_v54, 0.0 }
 0x471   :  { %v568_v58 = vpack.c.bf16 %v567_v57, %v566_v56 }
 0x473   :  { %1247 = vmatmul.mubr.bf16.vlgmr.msra.gmra.mxu1 %v568_v58 }
 0x474   :  { %1272 = vmatprep.mubr.msk.bf16.mxu1 %vm1501_vm0, %v1500_v0  ;;  %1257 = vmatpush3.bf16.msra.mxu1 %v1341_v59 }
 0x475   :  { %1258 = vmatprep.subr.bf16.mxu1 %v1500_v0 }
 0x478   :  { %1259 = vmatpush3.bf16.msra.mxu1 %v1342_v60  ;;  %v1354_v60 = vld [vmem:[#allocation8 + $0x90] sm:$0xff]  }
 0x479   :  { %1260 = vmatprep.subr.bf16.mxu1 %v1500_v0 }
 0x47c   :  { %1261 = vmatpush3.bf16.msra.mxu1 %v1343_v61  ;;  %v1355_v61 = vld [vmem:[#allocation8 + $0x88] sm:$0xff]  }
 0x47d   :  { %1262 = vmatprep.subr.bf16.mxu1 %v1500_v0 }
 0x480   :  { %1263 = vmatpush3.bf16.msra.mxu1 %v1344_v62  ;;  %v1356_v62 = vld [vmem:[#allocation8 + $0x80] sm:$0xff]  }
 0x481   :  { %1264 = vmatprep.subr.bf16.mxu1 %v1500_v0 }
 0x484   :  { %1265 = vmatpush3.bf16.msra.mxu1 %v1345_v63  ;;  %v762_v63 = vld [vmem:[#allocation10 + $0x10] sm:$0xff] }
 0x485   :  { %1266 = vmatprep.subr.bf16.mxu1 %v1500_v0 }
 0x488   :  { %1267 = vmatpush3.bf16.msra.mxu1 %v1346_v1  ;;  %v784_v1 = vrot.slane %v762_v63, %v1588_v30 }
 0x489   :  { %1268 = vmatprep.subr.bf16.mxu1 %v1500_v0 }
 0x48c   :  { %1269 = vmatpush3.bf16.msra.mxu1 %v1347_v46 }
 0x48d   :  { %1270 = vmatprep.subr.bf16.mxu1 %v1500_v0 }
 0x490   :  { %1271 = vmatpush3.bf16.msra.mxu1 %v1348_v47 }
 0x533   :  { %v672_v2 = vpop.f32.mrf.mxu1 }
 0x534   :  { %v673_v7 = vadd.f32 %v672_v2, %v589_v3 }
 0x535   :  { %v1248_v5 = vpop.f32.mrf.mxu1 }
 0x537   :  { %v675_v6 = vpop.f32.mrf.mxu1 }
 0x538   :  { %v676_v8 = vadd.f32 %v675_v6, %v589_v3 }
 0x539   :  { %v1249_v9 = vpop.f32.mrf.mxu1 }
 0x53a   :  { %v679_v10 = vadd.f32 %v676_v8, %v673_v7 }
 0x53c   :  { %v680_v11 = vrot.slane %v679_v10, 4 }
 0x53e   :  { %v681_v12 = vadd.f32 %v680_v11, %v679_v10 }
 0x540   :  { %v682_v13 = vrot.slane %v681_v12, 2 }
 0x542   :  { %v683_v14 = vadd.f32 %v682_v13, %v681_v12  ;;  %v897_v13 = vrot.slane %v762_v63, %v1603_v48 }
 0x544   :  { %v684_v17 = vrot.slane %v683_v14, 1 }
 0x546   :  { %v685_v18 = vadd.f32 %v684_v17, %v683_v14 }
 0x548   :  { %v686_v19 = vmul.f32 0.0625, %v685_v18 }
 0x54a   :  { %v687_v20 = vsub.f32 %v673_v7, %v686_v19  ;;  %v688_v21 = vsub.f32 %v676_v8, %v686_v19 }
 0x54c   :  { %v689_v22 = vmul.f32 %v687_v20, %v687_v20  ;;  %v690_v23 = vmul.f32 %v688_v21, %v688_v21 }
 0x54e   :  { %v691_v24 = vadd.f32 %v690_v23, %v689_v22 }
 0x550   :  { %v692_v25 = vrot.slane %v691_v24, 4 }
 0x552   :  { %v693_v26 = vadd.f32 %v692_v25, %v691_v24 }
 0x554   :  { %v694_v27 = vrot.slane %v693_v26, 2 }
 0x556   :  { %v695_v28 = vadd.f32 %v694_v27, %v693_v26 }
 0x558   :  { %v696_v29 = vrot.slane %v695_v28, 1 }
 0x55a   :  { %v697_v31 = vadd.f32 %v696_v29, %v695_v28 }
 0x55c   :  { %v698_v32 = vmul.f32 0.0625, %v697_v31 }
 0x55e   :  { %v699_v33 = vadd.f32 1e-05, %v698_v32 }
 0x560   :  { %1359 = vrsqrt.f32 %v699_v33 }
 0x56d   :  { %v1360_v35 = vpop.eup %1359 }
 0x56e   :  { %v701_v36 = vmul.f32 %v1360_v35, %v687_v20  ;;  %v702_v37 = vmul.f32 %v1360_v35, %v688_v21 }
 0x570   :  { %v707_v39 = vmul.f32 %v706_v34, %v701_v36  ;;  %v708_v40 = vmul.f32 %v706_v34, %v702_v37 }
 0x572   :  { %v714_v41 = vadd.f32 %v712_v38, %v708_v40  ;;  %v713_v42 = vadd.f32 %v712_v38, %v707_v39  ;;  %v1014_v40 = vrot.slane %v762_v63, %v1608_v15 }
 0x574   :  { %v716_v43 = vmax.f32 %v714_v41, 0.0  ;;  %v715_v44 = vmax.f32 %v713_v42, 0.0 }
 0x576   :  { %v717_v45 = vpack.c.bf16 %v716_v43, %v715_v44 }
 0x578   :  { %1251 = vmatpush3.bf16.msra.mxu0 %v717_v45 }
 0x579   :  { %1276 = vmatprep.subr.bf16.mxu0 %v1500_v0 }
 0x57b   :  { %1253 = vmatmul.mubr.msk.bf16.vlgmr.msra.gmra.mxu0 %vm100_vm1, %v1560_v4  ;;  %v1352_v4 = vld [vmem:[#allocation8 + $0xa0] sm:$0xff]  }
 0x57c   :  { %1292 = vmatprep.mubr.msk.bf16.mxu0 %vm1501_vm0, %v1500_v0  ;;  %1277 = vmatpush3.bf16.msra.mxu0 %v1349_v49 }
 0x57d   :  { %1278 = vmatprep.subr.bf16.mxu0 %v1500_v0 }
 0x580   :  { %1279 = vmatpush3.bf16.msra.mxu0 %v1350_v50 }
 0x581   :  { %1280 = vmatprep.subr.bf16.mxu0 %v1500_v0 }
 0x584   :  { %1281 = vmatpush3.bf16.msra.mxu0 %v1351_v51 }
 0x585   :  { %1282 = vmatprep.subr.bf16.mxu0 %v1500_v0 }
 0x588   :  { %1283 = vmatpush3.bf16.msra.mxu0 %v1352_v4 }
 0x589   :  { %1284 = vmatprep.subr.bf16.mxu0 %v1500_v0 }
 0x58c   :  { %1285 = vmatpush3.bf16.msra.mxu0 %v1353_v52 }
 0x58d   :  { %1286 = vmatprep.subr.bf16.mxu0 %v1500_v0 }
 0x590   :  { %1287 = vmatpush3.bf16.msra.mxu0 %v1354_v60 }
 0x591   :  { %1288 = vmatprep.subr.bf16.mxu0 %v1500_v0 }
 0x594   :  { %1289 = vmatpush3.bf16.msra.mxu0 %v1355_v61 }
 0x595   :  { %1290 = vmatprep.subr.bf16.mxu0 %v1500_v0 }
 0x598   :  { %1291 = vmatpush3.bf16.msra.mxu0 %v1356_v62 }
 0x63b   :  { %v752_v53 = vpop.f32.mrf.mxu0 }
 0x63c   :  { %v759_v56 = vadd.f32 %v752_v53, %v715_v44  ;;  %v1020_v44 = vrot.slane %v762_v63, %v1611_v16 }
 0x63d   :  { %v1254_v54 = vpop.f32.mrf.mxu0 }
 0x63f   :  { %v755_v55 = vpop.f32.mrf.mxu0 }
 0x640   :  { %v760_v57 = vadd.f32 %v755_v55, %v716_v43 }
 0x641   :  { %v1255_v58 = vpop.f32.mrf.mxu0 }
 0x642   :  { %v763_v59 = vpack.c.bf16 %v760_v57, %v759_v56 }
 0x644   :  { %1273 = vmatmul.mubr.bf16.vlgmr.msra.gmra.mxu1 %v763_v59 }
 0x704   :  { %v867_v2 = vpop.f32.mrf.mxu1 }
 0x705   :  { %v868_v5 = vadd.f32 %v867_v2, %v784_v1 }
 0x706   :  { %v1274_v3 = vpop.f32.mrf.mxu1 }
 0x707   :  { %v874_v9 = vmax.f32 %v868_v5, 0.0 }
 0x708   :  { %v870_v6 = vpop.f32.mrf.mxu1 }
 0x709   :  { %v871_v7 = vadd.f32 %v870_v6, %v784_v1 }
 0x70a   :  { %v1275_v8 = vpop.f32.mrf.mxu1 }
 0x70b   :  { %v875_v10 = vmax.f32 %v871_v7, 0.0 }
 0x70d   :  { %v876_v11 = vpack.c.bf16 %v875_v10, %v874_v9 }
 0x70f   :  { %1293 = vmatmul.mubr.bf16.vlgmr.msra.gmra.mxu0 %v876_v11 }
 0x7cf   :  { %v980_v12 = vpop.f32.mrf.mxu0 }
 0x7d0   :  { %v981_v17 = vadd.f32 %v980_v12, %v897_v13 }
 0x7d1   :  { %v1294_v14 = vpop.f32.mrf.mxu0 }
 0x7d3   :  { %v983_v0 = vpop.f32.mrf.mxu0 }
 0x7d4   :  { %v984_v18 = vadd.f32 %v983_v0, %v897_v13 }
 0x7d5   :  { %v1295_v19 = vpop.f32.mrf.mxu0 }
 0x7d6   :  { %v987_v20 = vadd.f32 %v984_v18, %v981_v17 }
 0x7d8   :  { %v988_v30 = vrot.slane %v987_v20, 4 }
 0x7da   :  { %v989_v21 = vadd.f32 %v988_v30, %v987_v20 }
 0x7dc   :  { %v990_v22 = vrot.slane %v989_v21, 2 }
 0x7de   :  { %v991_v23 = vadd.f32 %v990_v22, %v989_v21 }
 0x7e0   :  { %v992_v24 = vrot.slane %v991_v23, 1 }
 0x7e2   :  { %v993_v25 = vadd.f32 %v992_v24, %v991_v23 }
 0x7e4   :  { %v994_v26 = vmul.f32 0.0625, %v993_v25 }
 0x7e6   :  { %v995_v27 = vsub.f32 %v981_v17, %v994_v26  ;;  %v996_v28 = vsub.f32 %v984_v18, %v994_v26 }
 0x7e8   :  { %v997_v29 = vmul.f32 %v995_v27, %v995_v27  ;;  %v998_v31 = vmul.f32 %v996_v28, %v996_v28 }
 0x7ea   :  { %v999_v32 = vadd.f32 %v998_v31, %v997_v29 }
 0x7ec   :  { %v1000_v33 = vrot.slane %v999_v32, 4 }
 0x7ee   :  { %v1001_v48 = vadd.f32 %v1000_v33, %v999_v32 }
 0x7f0   :  { %v1002_v34 = vrot.slane %v1001_v48, 2 }
 0x7f2   :  { %v1003_v35 = vadd.f32 %v1002_v34, %v1001_v48 }
 0x7f4   :  { %v1004_v36 = vrot.slane %v1003_v35, 1 }
 0x7f6   :  { %v1005_v37 = vadd.f32 %v1004_v36, %v1003_v35 }
 0x7f8   :  { %v1006_v38 = vmul.f32 0.0625, %v1005_v37 }
 0x7fa   :  { %v1007_v39 = vadd.f32 1e-05, %v1006_v38 }
 0x7fc   :  { %1361 = vrsqrt.f32 %v1007_v39 }
 0x809   :  { %v1362_v41 = vpop.eup %1361 }
 0x80a   :  { %v1009_v42 = vmul.f32 %v1362_v41, %v995_v27  ;;  %v1010_v43 = vmul.f32 %v1362_v41, %v996_v28 }
 0x80c   :  { %v1016_v45 = vmul.f32 %v1014_v40, %v1010_v43  ;;  %v1015_v46 = vmul.f32 %v1014_v40, %v1009_v42 }
 0x80e   :  { %v1021_v47 = vadd.f32 %v1020_v44, %v1015_v46  ;;  %v1022_v49 = vadd.f32 %v1020_v44, %v1016_v45 }
 0x810   :  { %v1023_v50 = vmax.f32 %v1021_v47, 0.0  ;;  %v1024_v51 = vmax.f32 %v1022_v49, 0.0 }
 0x812   :  { %1025 = vst [vmem:[#allocation11] sm:$0xff] %v1023_v50  ;;  %1026 = vst [vmem:[#allocation11 + $0x8] sm:$0xff] %v1024_v51 }
 0x813   :  { %1474 = shalt.err (!%p1471_p1)
}
 0x814   :  { %1038 = dma.vmem_to_hbm [thread:$0]  %s1033_s4, 256, %s1680_s5, [#allocation4], %s1492_s21, %s1492_s21, %s1493_s22  }
 0x815   :  { %1489 = dma.done.wait [#allocation4], 256  }
 0x816   :  { %1490 = vsyncadd [#allocation4], 4294967040 }
 0x817   :  { %1042 = vsyncpa [#allocation3], 1 }
 0x818   :  { %1043 = vsyncpa [#allocation6], 1 }
 0x819   :  { %1044 = vsyncpa [#allocation9], 1 }
 0x81a   :  { %1045 = vsyncpa [#allocation4], 1 }

</bundles_post_ra>
